<compile_context>
chip_gen: v5e
topology: v5e:2x2
jax: 0.10.0
libtpu: 0.0.40
codegen_flags: <defaults>
</compile_context>

<pallas_src>
import functools

import jax
import jax.numpy as jnp
from jax.experimental import pallas as pl
from jax.experimental.pallas import tpu as pltpu

EPS = 1e-5  # torch.nn.BatchNorm3d default eps


def _round_up(x, m):
    return ((x + m - 1) // m) * m


def _pick_th(h, w, target_rows=256):
    """Largest divisor of h with th*w <= target_rows (accumulator sub-tile)."""
    th = 1
    for cand in range(1, h + 1):
        if h % cand == 0 and cand * w <= target_rows:
            th = cand
    return th


def _compiler_params(semantics, est_vmem_bytes):
    # Raise the scoped-VMEM limit only when the per-step block estimate gets
    # close to the smallest default (16 MiB on v5e); cap below v7x's 64 MiB.
    limit = None
    if est_vmem_bytes > 12 * 1024 * 1024:
        limit = int(min(max(est_vmem_bytes * 3 // 2, 32 * 1024 * 1024),
                        56 * 1024 * 1024))
    return pltpu.CompilerParams(dimension_semantics=semantics,
                                vmem_limit_bytes=limit)


# ----------------------------------------------------------------------------
# Pallas kernels
# ----------------------------------------------------------------------------
def _unit1_kernel(x_ref, w_ref, b_ref, o_ref, *, identity):
    """1x1x1 conv:  out = relu(x @ W_main + b) + residual  (one MXU pass)."""
    cp = b_ref.shape[-1]
    cin = x_ref.shape[-1]
    x = x_ref[...]
    y = jnp.dot(x, w_ref[...], preferred_element_type=jnp.float32)
    main = jnp.maximum(y[:, :cp] + b_ref[...], 0.0)
    if identity:                       # residual = x itself, no matmul needed
        res = x.astype(jnp.float32)
        if cp > cin:
            res = jnp.concatenate(
                [res, jnp.zeros((res.shape[0], cp - cin), jnp.float32)], axis=-1)
        out = main + res
    else:                              # residual = x @ W_last (second half of y)
        out = main + y[:, cp:]
    o_ref[...] = out.astype(o_ref.dtype)


def _unit3_kernel(xa_ref, xb_ref, w_ref, b_ref, o_ref, *,
                  td, th, identity, fold_taps):
    """3x3x3 SAME conv for one (batch, depth-tile) output block.

    xa_ref/xb_ref: (1, TD, H+2, W+2, Cin) bf16 — consecutive depth blocks of
                   the once-padded volume; together they hold the TD+2 halo.
    w_ref:         (3, 9*Cin, Wout) bf16 (taps folded)  or  (27, Cin, Wout),
                   Wout = Cp (identity residual) or 2*Cp (main | residual).
    b_ref:         (1, Cp) f32 folded BN bias
    o_ref:         (1, TD, H*W, Cp) bf16
    """
    cp = b_ref.shape[-1]
    _, _, hp, wp, cin = xa_ref.shape
    h, w = hp - 2, wp - 2
    wout = w_ref.shape[-1]
    bias = b_ref[...]

    def tap(pd, hs, he, ws, we):
        # padded-depth index pd in [0, TD+2) relative to this depth tile.
        r, p = (xa_ref, pd) if pd < td else (xb_ref, pd - td)
        return r[0, p, hs:he, ws:we, :]

    for t in range(td):                       # output depth within the tile
        for h0 in range(0, h, th):            # accumulator-resident M sub-tile
            rows = th * w
            acc = jnp.zeros((rows, wout), jnp.float32)
            for kd in range(3):
                if fold_taps:                 # K = 9*Cin, one MXU launch per kd
                    cols = [tap(t + kd, h0 + kh, h0 + kh + th, kw, kw + w)
                            .reshape(rows, cin)
                            for kh in range(3) for kw in range(3)]
                    slab = jnp.concatenate(cols, axis=-1)      # (rows, 9*Cin)
                    acc = acc + jnp.dot(slab, w_ref[kd],
                                        preferred_element_type=jnp.float32)
                else:                         # Cin >= 128 already feeds the MXU
                    for kh in range(3):
                        for kw in range(3):
                            s = tap(t + kd, h0 + kh, h0 + kh + th, kw, kw + w
                                    ).reshape(rows, cin)
                            acc = acc + jnp.dot(
                                s, w_ref[kd * 9 + kh * 3 + kw],
                                preferred_element_type=jnp.float32)
            main = jnp.maximum(acc[:, :cp] + bias, 0.0)
            if identity:                      # residual = centre tap (VPU add)
                res = tap(t + 1, 1 + h0, 1 + h0 + th, 1, 1 + w
                          ).reshape(rows, cin).astype(jnp.float32)
                if cp > cin:
                    res = jnp.concatenate(
                        [res, jnp.zeros((rows, cp - cin), jnp.float32)], axis=-1)
                out = main + res
            else:
                out = main + acc[:, cp:]
            o_ref[0, t, h0 * w:(h0 + th) * w, :] = out.astype(o_ref.dtype)


# ----------------------------------------------------------------------------
# Pallas wrappers (inputs/outputs NDHWC, channels padded to Cp inside)
# ----------------------------------------------------------------------------
def _unit3d_conv1(params, x, *, tm=1024):
    n, d, h, w, cin = x.shape
    cp = params["cp"]
    wcat = params["w_cat"]
    wout = wcat.shape[-1]
    m = n * d * h * w
    xb = x.astype(jnp.bfloat16).reshape(m, cin)
    tm = min(tm, _round_up(m, 8))
    mp = _round_up(m, tm)
    if mp != m:                                  # pad rows instead of asserting
        xb = jnp.pad(xb, ((0, mp - m), (0, 0)))
    # TODO(synk): padding Cin up to 128 would make input loads lane-dense for
    # channel counts like 192/480/832 at the cost of one extra wrapper pass.
    est = 2 * (tm * cin * 2) + 2 * (tm * cp * 2) + cin * wout * 2 + cp * 4
    out = pl.pallas_call(
        functools.partial(_unit1_kernel, identity=params["identity"]),
        out_shape=jax.ShapeDtypeStruct((mp, cp), jnp.bfloat16),
        grid_spec=pltpu.PrefetchScalarGridSpec(
            num_scalar_prefetch=0,
            grid=(mp // tm,),
            in_specs=[pl.BlockSpec((tm, cin), lambda i: (i, 0)),
                      pl.BlockSpec((cin, wout), lambda i: (0, 0)),
                      pl.BlockSpec((1, cp), lambda i: (0, 0))],
            out_specs=pl.BlockSpec((tm, cp), lambda i: (i, 0)),
        ),
        compiler_params=_compiler_params(("parallel",), est),
    )(xb, wcat, params["bias_row"])
    return out[:m].reshape(n, d, h, w, cp)


def _unit3d_conv3(params, x):
    n, d, h, w, cin = x.shape
    cp = params["cp"]
    wcat = params["w_cat"]
    wout = wcat.shape[-1]
    td = max(2, min(8, d))                       # output depths per grid step
    dp = _round_up(d, td)
    th = _pick_th(h, w)
    hp, wp = h + 2, w + 2
    xb = x.astype(jnp.bfloat16)
    # One zero-pad pass builds the SAME halo; depth is over-padded so the
    # second (z+1) halo block never runs out of range.
    xp = jnp.pad(xb, ((0, 0), (1, dp + td - d - 1), (1, 1), (1, 1), (0, 0)))
    est = (2 * 2 * (td * hp * wp * cin * 2)      # two halo blocks, dbl-buffered
           + 2 * (td * h * w * cp * 2)           # bf16 output block, dbl-buffered
           + wcat.size * 2 + cp * 4)             # resident weights + bias
    out = pl.pallas_call(
        functools.partial(_unit3_kernel, td=td, th=th,
                          identity=params["identity"],
                          fold_taps=params["fold_taps"]),
        out_shape=jax.ShapeDtypeStruct((n, dp, h * w, cp), jnp.bfloat16),
        grid_spec=pltpu.PrefetchScalarGridSpec(
            num_scalar_prefetch=0,
            grid=(n, dp // td),
            in_specs=[
                pl.BlockSpec((1, td, hp, wp, cin), lambda b, z: (b, z, 0, 0, 0)),
                pl.BlockSpec((1, td, hp, wp, cin), lambda b, z: (b, z + 1, 0, 0, 0)),
                pl.BlockSpec(wcat.shape, lambda b, z: (0, 0, 0)),
                pl.BlockSpec((1, cp), lambda b, z: (0, 0)),
            ],
            out_specs=pl.BlockSpec((1, td, h * w, cp), lambda b, z: (b, z, 0, 0)),
        ),
        compiler_params=_compiler_params(("parallel", "parallel"), est),
    )(xp, xp, wcat, params["bias_row"])
    return out[:, :d].reshape(n, d, h, w, cp)


def unit3d_forward_ndhwc(params, x, *, keep_padded_channels=False):
    """Unit3Dpy.forward on channels-last NDHWC activations (bf16 output).

    Prefer this entry point when stacking units so NCDHW<->NDHWC transposes and
    the channel strip happen only at model boundaries.
    """
    if params["ksize"] == 1:
        y = _unit3d_conv1(params, x)
    else:
        y = _unit3d_conv3(params, x)
    return y if keep_padded_channels else y[..., :params["cout"]]


def unit3d_forward(params, x_ncdhw):
    """Unit3Dpy.forward — NCDHW in, NCDHW out (like the PyTorch module)."""
    x = jnp.transpose(x_ncdhw, (0, 2, 3, 4, 1))          # -> NDHWC
    y = unit3d_forward_ndhwc(params, x)
    return jnp.transpose(y, (0, 4, 1, 2, 3))             # -> NCDHW


# ----------------------------------------------------------------------------
# Parameter construction (random conv weights + BN stats, folded & packed)
# ----------------------------------------------------------------------------
def init_unit_params(key, cin, cout, ksize):
    assert ksize in (1, 3), "only 1x1x1 / 3x3x3 stride-1 SAME convs supported"
    taps = ksize ** 3
    identity = (cin == cout)
    fold_taps = (ksize == 3) and (cin < 128)
    kmain, klast, kg, kb, km, kv = jax.random.split(key, 6)
    std = 1.0 / jnp.sqrt(float(taps * cin))
    w = jax.random.normal(kmain, (taps, cin, cout), jnp.float32) * std

    gamma = 1.0 + 0.1 * jax.random.normal(kg, (cout,), jnp.float32)
    beta = 0.1 * jax.random.normal(kb, (cout,), jnp.float32)
    mean = 0.1 * jax.random.normal(km, (cout,), jnp.float32)
    var = jax.random.uniform(kv, (cout,), jnp.float32, 0.5, 1.5)
    scale = gamma * jax.lax.rsqrt(var + EPS)
    bias = beta - mean * scale

    # Fold BN scale into the conv weights; bf16 operands, f32 MXU accumulate.
    w_main_bf = (w * scale[None, None, :]).astype(jnp.bfloat16)
    cp = _round_up(cout, 128)                 # lane-dense output channel slab
    pad_c = ((0, 0), (0, 0), (0, cp - cout))
    w_main_p = jnp.pad(w_main_bf, pad_c)

    if identity:
        # Residual is a direct in-kernel add of the centre tap (no matmul).
        w_res_bf = None
        w_cat = w_main_p                                       # (taps, cin, cp)
    else:                  # Unit3Dpy.last_conv (same kernel size, no bias)
        w_res = jax.random.normal(klast, (taps, cin, cout), jnp.float32) * std
        w_res_bf = w_res.astype(jnp.bfloat16)
        w_cat = jnp.concatenate([w_main_p, jnp.pad(w_res_bf, pad_c)], axis=-1)

    wout = w_cat.shape[-1]
    if ksize == 1:
        w_cat = w_cat.reshape(cin, wout)
    elif fold_taps:
        w_cat = w_cat.reshape(3, 9 * cin, wout)   # rows ordered (kh, kw, cin)
    # else keep (27, cin, wout): per-tap dots, K=cin already feeds the MXU.

    bias_row = jnp.pad(bias, (0, cp - cout)).reshape(1, cp).astype(jnp.float32)

    return {"cin": cin, "cout": cout, "ksize": ksize, "cp": cp,
            "identity": identity, "fold_taps": fold_taps,
            "w_cat": w_cat, "bias_row": bias_row,
            "w_main_bf": w_main_bf, "w_res_bf": w_res_bf}


# ----------------------------------------------------------------------------
# Pure-JAX reference (verification only; uses the same bf16-prepared weights)
# ----------------------------------------------------------------------------
def _conv_ref(x, w_taps, ksize):
    taps, cin, cout = w_taps.shape
    w = w_taps.astype(jnp.float32).reshape(ksize, ksize, ksize, cin, cout)
    return jax.lax.conv_general_dilated(
        x, w, window_strides=(1, 1, 1), padding="SAME",
        dimension_numbers=("NDHWC", "DHWIO", "NDHWC"),
        precision=jax.lax.Precision.HIGHEST)


def unit3d_reference(params, x_ncdhw):
    x = jnp.transpose(x_ncdhw, (0, 2, 3, 4, 1))
    xb = x.astype(jnp.bfloat16).astype(jnp.float32)   # kernel uses bf16 activations
    cout = params["cout"]
    bias = params["bias_row"][0, :cout]
    y = jnp.maximum(_conv_ref(xb, params["w_main_bf"], params["ksize"]) + bias, 0.0)
    if params["identity"]:
        r = xb
    else:
        r = _conv_ref(xb, params["w_res_bf"], params["ksize"])
    return jnp.transpose(y + r, (0, 4, 1, 2, 3))


# ----------------------------------------------------------------------------
if __name__ == "__main__":
    key = jax.random.PRNGKey(0)
    kx, kp = jax.random.split(key)
    N, D, H, W = 2, 4, 8, 8

    # (cin, cout, ksize): covers 1x1x1 / 3x3x3 and last_conv / identity residual.
    configs = [(4, 8, 1), (4, 4, 1), (4, 8, 3), (8, 8, 3)]
    pkeys = jax.random.split(kp, len(configs))

    for (cin, cout, ksize), pk in zip(configs, pkeys):
        params = init_unit_params(pk, cin, cout, ksize)
        x = jax.random.normal(kx, (N, cin, D, H, W), jnp.float32)
        y = jax.block_until_ready(unit3d_forward(params, x))
        assert y.shape == (N, cout, D, H, W), y.shape
        y_ref = unit3d_reference(params, x)
        # bf16 output -> relative tolerance (kernel rounds the final f32 sum).
        rel_err = float(jnp.max(jnp.abs(y.astype(jnp.float32) - y_ref)
                                / (jnp.abs(y_ref) + 1.0)))
        assert rel_err < 2e-2, f"cfg {(cin, cout, ksize)}: rel error {rel_err}"

    print("KERNEL_OK")
</pallas_src>

<mosaic_0001>
module attributes {stable_mosaic.version = 11 : i64} {
  func.func @_unit1_kernel(%arg0: i32, %arg1: memref<512x4xbf16, #tpu.memory_space<vmem>>, %arg2: memref<4x256xbf16, #tpu.memory_space<vmem>>, %arg3: memref<1x128xf32, #tpu.memory_space<vmem>>, %arg4: memref<512x128xbf16, #tpu.memory_space<vmem>>) attributes {dimension_semantics = [#tpu.dimension_semantics<parallel>], iteration_bounds = array<i64: 1>, scalar_prefetch = 0 : i64, scratch_operands = 0 : i64, tpu.core_type = #tpu.core_type<tc>, window_params = [{transform_indices = @transform_0, window_bounds = array<i64: 512, 4>}, {pipeline_mode = #tpu.pipeline_mode<synchronous>, transform_indices = @transform_1, window_bounds = array<i64: 4, 256>}, {pipeline_mode = #tpu.pipeline_mode<synchronous>, transform_indices = @transform_2, window_bounds = array<i64: 1, 128>}, {transform_indices = @transform_3, window_bounds = array<i64: 512, 128>}]} {
    %c0 = arith.constant 0 : index
    %c0_0 = arith.constant 0 : index
    %0 = vector.load %arg1[%c0, %c0_0] : memref<512x4xbf16, #tpu.memory_space<vmem>>, vector<512x4xbf16>
    %c0_1 = arith.constant 0 : index
    %c0_2 = arith.constant 0 : index
    %1 = vector.load %arg2[%c0_1, %c0_2] : memref<4x256xbf16, #tpu.memory_space<vmem>>, vector<4x256xbf16>
    %cst = arith.constant dense<0.000000e+00> : vector<512x256xf32>
    %2 = tpu.matmul %0, %1, %cst {dimension_numbers = #tpu.dot_dimension_numbers<[1], [0], [0], [1], [0, 0, 1, 1], [], []>} : vector<512x4xbf16>, vector<4x256xbf16>, vector<512x256xf32> -> vector<512x256xf32>
    %3 = vector.extract_strided_slice %2 {offsets = [0, 0], sizes = [512, 128], strides = [1, 1]} : vector<512x256xf32> to vector<512x128xf32>
    %c0_3 = arith.constant 0 : index
    %c0_4 = arith.constant 0 : index
    %4 = vector.load %arg3[%c0_3, %c0_4] : memref<1x128xf32, #tpu.memory_space<vmem>>, vector<1x128xf32>
    %5 = vector.broadcast %4 : vector<1x128xf32> to vector<512x128xf32>
    %6 = arith.addf %3, %5 : vector<512x128xf32>
    %cst_5 = arith.constant 0.000000e+00 : f32
    %7 = vector.broadcast %cst_5 : f32 to vector<512x128xf32>
    %8 = arith.maximumf %6, %7 : vector<512x128xf32>
    %9 = vector.extract_strided_slice %2 {offsets = [0, 128], sizes = [512, 128], strides = [1, 1]} : vector<512x256xf32> to vector<512x128xf32>
    %10 = arith.addf %8, %9 : vector<512x128xf32>
    %11 = arith.truncf %10 : vector<512x128xf32> to vector<512x128xbf16>
    %c0_6 = arith.constant 0 : index
    %c0_7 = arith.constant 0 : index
    %12 = vector.load %arg4[%c0_6, %c0_7] : memref<512x128xbf16, #tpu.memory_space<vmem>>, vector<512x128xbf16>
    tpu.vector_store %arg4[%c0_6, %c0_7], %11 {strides = array<i32>} : memref<512x128xbf16, #tpu.memory_space<vmem>>, vector<512x128xbf16>,
    return
  }
  func.func @transform_0(%arg0: i32) -> (i32, i32) {
    %c0_i32 = arith.constant 0 : i32
    %c0_i32_0 = arith.constant 0 : i32
    return %arg0, %c0_i32 : i32, i32
  }
  func.func @transform_1(%arg0: i32) -> (i32, i32) {
    %c0_i32 = arith.constant 0 : i32
    %c0_i32_0 = arith.constant 0 : i32
    %c0_i32_1 = arith.constant 0 : i32
    return %c0_i32, %c0_i32_0 : i32, i32
  }
  func.func @transform_2(%arg0: i32) -> (i32, i32) {
    %c0_i32 = arith.constant 0 : i32
    %c0_i32_0 = arith.constant 0 : i32
    %c0_i32_1 = arith.constant 0 : i32
    return %c0_i32, %c0_i32_0 : i32, i32
  }
  func.func @transform_3(%arg0: i32) -> (i32, i32) {
    %c0_i32 = arith.constant 0 : i32
    %c0_i32_0 = arith.constant 0 : i32
    return %arg0, %c0_i32 : i32, i32
  }
}

</mosaic_0001>

<bundles_post_ra>
// kernel: tpu_custom_call.1
= control target key start
LH: loop header
LB: loop body
LE: loop exit
PB: predicated region body
PF: predicated region fallthrough
CT: control target
= control target key end

     0   :  { %s1732_s0 = inlined_call_operand.vmem [shape: bf16[512,4], index: 0, kind: input, shape index: {}]   ;;  %s1733_s1 = inlined_call_operand.vmem [shape: bf16[4,256], index: 1, kind: input, shape index: {}]   ;;  %s1734_s2 = inlined_call_operand.vmem [shape: f32[1,128], index: 2, kind: input, shape index: {}]   ;;  %s1735_s3 = inlined_call_operand.hbm [shape: bf16[512,128], index: 3, kind: output, shape index: {}]  }
   0x1   :  { %v80_v0 = vld [vmem:[%s1733_s1] sm:$0xf] }
   0x2   :  { %242 = vst [vmem:[#allocation1] ss:$4 sm:$0xff] %v80_v0 }
   0x3   :  { %8 = vsyncpa [#allocation3], 0  ;;  %vm342_vm0 = vcmask 1041408   ;;  %v1219_v5 = vld [vmem:[%s1732_s0] sm:$0xff]  ;;  %vm245_vm1 = vcmask 31744   ;;  %v1220_v7 = vld [vmem:[%s1732_s0 + $0x8] sm:$0xff] }
   0x4   :  { %v1235_v6 = vld [vmem:[%s1732_s0 + $0x80] sm:$0xff]  ;;  %v1236_v8 = vld [vmem:[%s1732_s0 + $0x88] sm:$0xff]  ;;  %v1221_v9 = vld [vmem:[%s1732_s0 + $0x10] sm:$0xff]  ;;  %s1015_s24 = sshll.u32 %s1735_s3, 4  ;;  %s1475_s25 = smov 64   ;;  %s1016_s24 = int_to_ptr.hbm [resolvable:$true] %s1015_s24 }
   0x5   :  { %v1237_v10 = vld [vmem:[%s1732_s0 + $0x90] sm:$0xff]  ;;  %v1222_v11 = vld [vmem:[%s1732_s0 + $0x18] sm:$0xff]  ;;  %v1223_v13 = vld [vmem:[%s1732_s0 + $0x20] sm:$0xff]  ;;  %s1476_s26 = smov 4  }
   0x6   :  { %v1238_v12 = vld [vmem:[%s1732_s0 + $0x98] sm:$0xff]  ;;  %v1239_v14 = vld [vmem:[%s1732_s0 + $0xa0] sm:$0xff]  ;;  %v1224_v15 = vld [vmem:[%s1732_s0 + $0x28] sm:$0xff] }
   0x7   :  { %v1240_v16 = vld [vmem:[%s1732_s0 + $0xa8] sm:$0xff]  ;;  %v1225_v17 = vld [vmem:[%s1732_s0 + $0x30] sm:$0xff]  ;;  %v1226_v19 = vld [vmem:[%s1732_s0 + $0x38] sm:$0xff] }
   0x8   :  { %v1241_v18 = vld [vmem:[%s1732_s0 + $0xb0] sm:$0xff]  ;;  %v1242_v20 = vld [vmem:[%s1732_s0 + $0xb8] sm:$0xff]  ;;  %v1227_v21 = vld [vmem:[%s1732_s0 + $0x40] sm:$0xff] }
   0x9   :  { %v243_v1 = vld.sshfl [vmem:[#allocation1] sm:$0xff pattern:$0x73625140]  ;;  %v244_v2 = vld.sshfl [vmem:[#allocation1 + $0x8] sm:$0xff pattern:$0x73625140] }
   0xa   :  { %v343_v3 = vsel %vm342_vm0, %v243_v1, 0  ;;  %v345_v4 = vsel %vm342_vm0, %v244_v2, 0  ;;  %v1243_v22 = vld [vmem:[%s1732_s0 + $0xc0] sm:$0xff]  ;;  %v1228_v42 = vld [vmem:[%s1732_s0 + $0x48] sm:$0xff]  ;;  %v1229_v2 = vld [vmem:[%s1732_s0 + $0x50] sm:$0xff] }
   0xb   :  { %354 = vmatpush.bf16.msra.mxu0 %v343_v3  ;;  %1442 = vmatpush.bf16.msra.mxu2 %v343_v3  ;;  %v1589_v24 = vld [vmem:[%s1734_s2] ss:$0 sm:$0xff]  ;;  %v1244_v43 = vld [vmem:[%s1732_s0 + $0xc8] sm:$0xff]  ;;  %v1245_v3 = vld [vmem:[%s1732_s0 + $0xd0] sm:$0xff] }
   0xc   :  { %1443 = vmatpush.bf16.msra.mxu3 %v345_v4  ;;  %523 = vmatpush.bf16.msra.mxu1 %v345_v4 }
   0xe   :  { %1155 = vmatmul.msk.bf16.vlgmr.msra.gmra.mxu0 %vm245_vm1, %v1219_v5  ;;  %1171 = vmatmul.msk.bf16.vlgmr.msra.gmra.mxu2 %vm245_vm1, %v1235_v6 }
   0xf   :  { %1203 = vmatmul.msk.bf16.vlgmr.msra.gmra.mxu3 %vm245_vm1, %v1235_v6  ;;  %1187 = vmatmul.msk.bf16.vlgmr.msra.gmra.mxu1 %vm245_vm1, %v1219_v5 }
  0x1e   :  { %1156 = vmatmul.msk.bf16.gmra.mxu0 %vm245_vm1, %v1220_v7  ;;  %1172 = vmatmul.msk.bf16.gmra.mxu2 %vm245_vm1, %v1236_v8 }
  0x1f   :  { %1204 = vmatmul.msk.bf16.gmra.mxu3 %vm245_vm1, %v1236_v8  ;;  %1188 = vmatmul.msk.bf16.gmra.mxu1 %vm245_vm1, %v1220_v7 }
  0x2e   :  { %1157 = vmatmul.msk.bf16.gmra.mxu0 %vm245_vm1, %v1221_v9  ;;  %1173 = vmatmul.msk.bf16.gmra.mxu2 %vm245_vm1, %v1237_v10 }
  0x2f   :  { %1205 = vmatmul.msk.bf16.gmra.mxu3 %vm245_vm1, %v1237_v10  ;;  %1189 = vmatmul.msk.bf16.gmra.mxu1 %vm245_vm1, %v1221_v9 }
  0x3e   :  { %1158 = vmatmul.msk.bf16.gmra.mxu0 %vm245_vm1, %v1222_v11  ;;  %1174 = vmatmul.msk.bf16.gmra.mxu2 %vm245_vm1, %v1238_v12 }
  0x3f   :  { %1206 = vmatmul.msk.bf16.gmra.mxu3 %vm245_vm1, %v1238_v12  ;;  %1190 = vmatmul.msk.bf16.gmra.mxu1 %vm245_vm1, %v1222_v11 }
  0x4e   :  { %1159 = vmatmul.msk.bf16.gmra.mxu0 %vm245_vm1, %v1223_v13  ;;  %1175 = vmatmul.msk.bf16.gmra.mxu2 %vm245_vm1, %v1239_v14 }
  0x4f   :  { %1207 = vmatmul.msk.bf16.gmra.mxu3 %vm245_vm1, %v1239_v14  ;;  %1191 = vmatmul.msk.bf16.gmra.mxu1 %vm245_vm1, %v1223_v13 }
  0x5e   :  { %1160 = vmatmul.msk.bf16.gmra.mxu0 %vm245_vm1, %v1224_v15  ;;  %1176 = vmatmul.msk.bf16.gmra.mxu2 %vm245_vm1, %v1240_v16 }
  0x5f   :  { %1208 = vmatmul.msk.bf16.gmra.mxu3 %vm245_vm1, %v1240_v16  ;;  %1192 = vmatmul.msk.bf16.gmra.mxu1 %vm245_vm1, %v1224_v15 }
  0x6e   :  { %1161 = vmatmul.msk.bf16.gmra.mxu0 %vm245_vm1, %v1225_v17  ;;  %1177 = vmatmul.msk.bf16.gmra.mxu2 %vm245_vm1, %v1241_v18 }
  0x6f   :  { %1209 = vmatmul.msk.bf16.gmra.mxu3 %vm245_vm1, %v1241_v18  ;;  %1193 = vmatmul.msk.bf16.gmra.mxu1 %vm245_vm1, %v1225_v17 }
  0x7e   :  { %1162 = vmatmul.msk.bf16.gmra.mxu0 %vm245_vm1, %v1226_v19  ;;  %1178 = vmatmul.msk.bf16.gmra.mxu2 %vm245_vm1, %v1242_v20 }
  0x7f   :  { %1210 = vmatmul.msk.bf16.gmra.mxu3 %vm245_vm1, %v1242_v20  ;;  %1194 = vmatmul.msk.bf16.gmra.mxu1 %vm245_vm1, %v1226_v19 }
  0x8b   :  { %v356_v23 = vpop.f32.mrf.mxu0 }
  0x8c   :  { %v525_v25 = vpop.f32.mrf.mxu1  ;;  %v689_v26 = vadd.f32 %v1589_v24, %v356_v23 }
  0x8e   :  { %1163 = vmatmul.msk.bf16.gmra.mxu0 %vm245_vm1, %v1227_v21  ;;  %1179 = vmatmul.msk.bf16.gmra.mxu2 %vm245_vm1, %v1243_v22  ;;  %v753_v30 = vmax.f32 %v689_v26, 0.0 }
  0x8f   :  { %1211 = vmatmul.msk.bf16.gmra.mxu3 %vm245_vm1, %v1243_v22  ;;  %1195 = vmatmul.msk.bf16.gmra.mxu1 %vm245_vm1, %v1227_v21 }
  0x90   :  { %v817_v35 = vadd.f32 %v753_v30, %v525_v25 }
  0x91   :  { %v436_v27 = vpop.f32.mrf.mxu2 }
  0x92   :  { %v605_v28 = vpop.f32.mrf.mxu3  ;;  %v721_v33 = vadd.f32 %v1589_v24, %v436_v27  ;;  %v1230_v27 = vld [vmem:[%s1732_s0 + $0x58] sm:$0xff] }
  0x93   :  { %v358_v29 = vpop.f32.mrf.mxu0 }
  0x94   :  { %v690_v31 = vadd.f32 %v1589_v24, %v358_v29  ;;  %v527_v32 = vpop.f32.mrf.mxu1  ;;  %v785_v38 = vmax.f32 %v721_v33, 0.0 }
  0x96   :  { %v754_v34 = vmax.f32 %v690_v31, 0.0  ;;  %v849_v47 = vadd.f32 %v785_v38, %v605_v28  ;;  %v1246_v28 = vld [vmem:[%s1732_s0 + $0xd8] sm:$0xff] }
  0x98   :  { %v818_v36 = vadd.f32 %v754_v34, %v527_v32 }
  0x99   :  { %v438_v37 = vpop.f32.mrf.mxu2 }
  0x9a   :  { %v1254_v39 = vpack.c.bf16 %v818_v36, %v817_v35  ;;  %v722_v40 = vadd.f32 %v1589_v24, %v438_v37  ;;  %v607_v41 = vpop.f32.mrf.mxu3 }
  0x9b   :  { %v361_v44 = vpop.f32.mrf.mxu0 }
  0x9c   :  { %1255 = vst [vmem:[#allocation2] sm:$0xff] %v1254_v39   ;;  %v786_v45 = vmax.f32 %v722_v40, 0.0  ;;  %v530_v46 = vpop.f32.mrf.mxu1  ;;  %v691_v50 = vadd.f32 %v1589_v24, %v361_v44 }
  0x9e   :  { %v850_v48 = vadd.f32 %v786_v45, %v607_v41  ;;  %1164 = vmatmul.msk.bf16.gmra.mxu0 %vm245_vm1, %v1228_v42  ;;  %1180 = vmatmul.msk.bf16.gmra.mxu2 %vm245_vm1, %v1244_v43  ;;  %v755_v54 = vmax.f32 %v691_v50, 0.0 }
  0x9f   :  { %1212 = vmatmul.msk.bf16.gmra.mxu3 %vm245_vm1, %v1244_v43  ;;  %1196 = vmatmul.msk.bf16.gmra.mxu1 %vm245_vm1, %v1228_v42 }
  0xa0   :  { %v1334_v49 = vpack.c.bf16 %v850_v48, %v849_v47  ;;  %v819_v59 = vadd.f32 %v755_v54, %v530_v46 }
  0xa1   :  { %v441_v51 = vpop.f32.mrf.mxu2 }
  0xa2   :  { %1426 = vst [vmem:[#allocation2 + $0x80] sm:$0xff] %v1334_v49   ;;  %v610_v52 = vpop.f32.mrf.mxu3  ;;  %v723_v57 = vadd.f32 %v1589_v24, %v441_v51  ;;  %v1231_v51 = vld [vmem:[%s1732_s0 + $0x60] sm:$0xff] }
  0xa3   :  { %v363_v53 = vpop.f32.mrf.mxu0 }
  0xa4   :  { %v692_v55 = vadd.f32 %v1589_v24, %v363_v53  ;;  %v532_v56 = vpop.f32.mrf.mxu1  ;;  %v787_v62 = vmax.f32 %v723_v57, 0.0 }
  0xa6   :  { %v756_v58 = vmax.f32 %v692_v55, 0.0  ;;  %v851_v7 = vadd.f32 %v787_v62, %v610_v52  ;;  %v1247_v52 = vld [vmem:[%s1732_s0 + $0xe0] sm:$0xff] }
  0xa8   :  { %v820_v60 = vadd.f32 %v756_v58, %v532_v56 }
  0xa9   :  { %v443_v61 = vpop.f32.mrf.mxu2 }
  0xaa   :  { %v1259_v63 = vpack.c.bf16 %v820_v60, %v819_v59  ;;  %v724_v0 = vadd.f32 %v1589_v24, %v443_v61  ;;  %v612_v1 = vpop.f32.mrf.mxu3 }
  0xab   :  { %v366_v4 = vpop.f32.mrf.mxu0 }
  0xac   :  { %1411 = vst [vmem:[#allocation2 + $0x8] sm:$0xff] %v1259_v63   ;;  %v788_v5 = vmax.f32 %v724_v0, 0.0  ;;  %v535_v6 = vpop.f32.mrf.mxu1  ;;  %v693_v10 = vadd.f32 %v1589_v24, %v366_v4 }
  0xae   :  { %v852_v8 = vadd.f32 %v788_v5, %v612_v1  ;;  %1165 = vmatmul.msk.bf16.gmra.mxu0 %vm245_vm1, %v1229_v2  ;;  %1181 = vmatmul.msk.bf16.gmra.mxu2 %vm245_vm1, %v1245_v3  ;;  %v757_v14 = vmax.f32 %v693_v10, 0.0 }
  0xaf   :  { %1213 = vmatmul.msk.bf16.gmra.mxu3 %vm245_vm1, %v1245_v3  ;;  %1197 = vmatmul.msk.bf16.gmra.mxu1 %vm245_vm1, %v1229_v2 }
  0xb0   :  { %v1339_v9 = vpack.c.bf16 %v852_v8, %v851_v7  ;;  %v821_v19 = vadd.f32 %v757_v14, %v535_v6 }
  0xb1   :  { %v446_v11 = vpop.f32.mrf.mxu2 }
  0xb2   :  { %1427 = vst [vmem:[#allocation2 + $0x88] sm:$0xff] %v1339_v9   ;;  %v615_v12 = vpop.f32.mrf.mxu3  ;;  %v725_v17 = vadd.f32 %v1589_v24, %v446_v11  ;;  %v1232_v11 = vld [vmem:[%s1732_s0 + $0x68] sm:$0xff] }
  0xb3   :  { %v368_v13 = vpop.f32.mrf.mxu0 }
  0xb4   :  { %v694_v15 = vadd.f32 %v1589_v24, %v368_v13  ;;  %v537_v16 = vpop.f32.mrf.mxu1  ;;  %v789_v22 = vmax.f32 %v725_v17, 0.0 }
  0xb6   :  { %v758_v18 = vmax.f32 %v694_v15, 0.0  ;;  %v853_v32 = vadd.f32 %v789_v22, %v615_v12  ;;  %v1248_v12 = vld [vmem:[%s1732_s0 + $0xe8] sm:$0xff] }
  0xb8   :  { %v822_v20 = vadd.f32 %v758_v18, %v537_v16 }
  0xb9   :  { %v448_v21 = vpop.f32.mrf.mxu2 }
  0xba   :  { %v1264_v23 = vpack.c.bf16 %v822_v20, %v821_v19  ;;  %v726_v25 = vadd.f32 %v1589_v24, %v448_v21  ;;  %v617_v26 = vpop.f32.mrf.mxu3 }
  0xbb   :  { %v371_v29 = vpop.f32.mrf.mxu0 }
  0xbc   :  { %1412 = vst [vmem:[#allocation2 + $0x10] sm:$0xff] %v1264_v23   ;;  %v790_v30 = vmax.f32 %v726_v25, 0.0  ;;  %v540_v31 = vpop.f32.mrf.mxu1  ;;  %v695_v35 = vadd.f32 %v1589_v24, %v371_v29 }
  0xbe   :  { %v854_v33 = vadd.f32 %v790_v30, %v617_v26  ;;  %1166 = vmatmul.msk.bf16.gmra.mxu0 %vm245_vm1, %v1230_v27  ;;  %1182 = vmatmul.msk.bf16.gmra.mxu2 %vm245_vm1, %v1246_v28  ;;  %v759_v39 = vmax.f32 %v695_v35, 0.0 }
  0xbf   :  { %1214 = vmatmul.msk.bf16.gmra.mxu3 %vm245_vm1, %v1246_v28  ;;  %1198 = vmatmul.msk.bf16.gmra.mxu1 %vm245_vm1, %v1230_v27 }
  0xc0   :  { %v1344_v34 = vpack.c.bf16 %v854_v33, %v853_v32  ;;  %v823_v44 = vadd.f32 %v759_v39, %v540_v31 }
  0xc1   :  { %v451_v36 = vpop.f32.mrf.mxu2 }
  0xc2   :  { %1428 = vst [vmem:[#allocation2 + $0x90] sm:$0xff] %v1344_v34   ;;  %v620_v37 = vpop.f32.mrf.mxu3  ;;  %v727_v42 = vadd.f32 %v1589_v24, %v451_v36  ;;  %v1233_v36 = vld [vmem:[%s1732_s0 + $0x70] sm:$0xff] }
  0xc3   :  { %v373_v38 = vpop.f32.mrf.mxu0 }
  0xc4   :  { %v696_v40 = vadd.f32 %v1589_v24, %v373_v38  ;;  %v542_v41 = vpop.f32.mrf.mxu1  ;;  %v791_v47 = vmax.f32 %v727_v42, 0.0 }
  0xc6   :  { %v760_v43 = vmax.f32 %v696_v40, 0.0  ;;  %v855_v56 = vadd.f32 %v791_v47, %v620_v37  ;;  %v1249_v37 = vld [vmem:[%s1732_s0 + $0xf0] sm:$0xff] }
  0xc8   :  { %v824_v45 = vadd.f32 %v760_v43, %v542_v41 }
  0xc9   :  { %v453_v46 = vpop.f32.mrf.mxu2 }
  0xca   :  { %v1269_v48 = vpack.c.bf16 %v824_v45, %v823_v44  ;;  %v728_v49 = vadd.f32 %v1589_v24, %v453_v46  ;;  %v622_v50 = vpop.f32.mrf.mxu3 }
  0xcb   :  { %v376_v53 = vpop.f32.mrf.mxu0 }
  0xcc   :  { %1413 = vst [vmem:[#allocation2 + $0x18] sm:$0xff] %v1269_v48   ;;  %v792_v54 = vmax.f32 %v728_v49, 0.0  ;;  %v545_v55 = vpop.f32.mrf.mxu1  ;;  %v697_v59 = vadd.f32 %v1589_v24, %v376_v53 }
  0xce   :  { %v856_v57 = vadd.f32 %v792_v54, %v622_v50  ;;  %1167 = vmatmul.msk.bf16.gmra.mxu0 %vm245_vm1, %v1231_v51  ;;  %1183 = vmatmul.msk.bf16.gmra.mxu2 %vm245_vm1, %v1247_v52  ;;  %v761_v63 = vmax.f32 %v697_v59, 0.0 }
  0xcf   :  { %1215 = vmatmul.msk.bf16.gmra.mxu3 %vm245_vm1, %v1247_v52  ;;  %1199 = vmatmul.msk.bf16.gmra.mxu1 %vm245_vm1, %v1231_v51 }
  0xd0   :  { %v1349_v58 = vpack.c.bf16 %v856_v57, %v855_v56  ;;  %v825_v4 = vadd.f32 %v761_v63, %v545_v55 }
  0xd1   :  { %v456_v60 = vpop.f32.mrf.mxu2 }
  0xd2   :  { %1429 = vst [vmem:[#allocation2 + $0x98] sm:$0xff] %v1349_v58   ;;  %v625_v61 = vpop.f32.mrf.mxu3  ;;  %v729_v2 = vadd.f32 %v1589_v24, %v456_v60  ;;  %v1234_v60 = vld [vmem:[%s1732_s0 + $0x78] sm:$0xff] }
  0xd3   :  { %v378_v62 = vpop.f32.mrf.mxu0 }
  0xd4   :  { %v698_v0 = vadd.f32 %v1589_v24, %v378_v62  ;;  %v547_v1 = vpop.f32.mrf.mxu1  ;;  %v793_v7 = vmax.f32 %v729_v2, 0.0 }
  0xd6   :  { %v762_v3 = vmax.f32 %v698_v0, 0.0  ;;  %v857_v16 = vadd.f32 %v793_v7, %v625_v61  ;;  %v1250_v61 = vld [vmem:[%s1732_s0 + $0xf8] sm:$0xff]  ;;  %s1474_s0 = smov [#allocation2]  }
  0xd7   :  { %s1013_s22 = sshll.u32 %s1474_s0, 4  ;;  %s1014_s22 = int_to_ptr.vmem [resolvable:$true] %s1013_s22 }
  0xd8   :  { %v826_v5 = vadd.f32 %v762_v3, %v547_v1 }
  0xd9   :  { %v458_v6 = vpop.f32.mrf.mxu2 }
  0xda   :  { %v1274_v8 = vpack.c.bf16 %v826_v5, %v825_v4  ;;  %v730_v9 = vadd.f32 %v1589_v24, %v458_v6  ;;  %v627_v10 = vpop.f32.mrf.mxu3 }
  0xdb   :  { %v381_v13 = vpop.f32.mrf.mxu0 }
  0xdc   :  { %1414 = vst [vmem:[#allocation2 + $0x20] sm:$0xff] %v1274_v8   ;;  %v794_v14 = vmax.f32 %v730_v9, 0.0  ;;  %v550_v15 = vpop.f32.mrf.mxu1  ;;  %v699_v19 = vadd.f32 %v1589_v24, %v381_v13 }
  0xde   :  { %v858_v17 = vadd.f32 %v794_v14, %v627_v10  ;;  %1168 = vmatmul.msk.bf16.gmra.mxu0 %vm245_vm1, %v1232_v11  ;;  %1184 = vmatmul.msk.bf16.gmra.mxu2 %vm245_vm1, %v1248_v12  ;;  %v763_v23 = vmax.f32 %v699_v19, 0.0 }
  0xdf   :  { %1216 = vmatmul.msk.bf16.gmra.mxu3 %vm245_vm1, %v1248_v12  ;;  %1200 = vmatmul.msk.bf16.gmra.mxu1 %vm245_vm1, %v1232_v11 }
  0xe0   :  { %v1354_v18 = vpack.c.bf16 %v858_v17, %v857_v16  ;;  %v827_v29 = vadd.f32 %v763_v23, %v550_v15 }
  0xe1   :  { %v461_v20 = vpop.f32.mrf.mxu2 }
  0xe2   :  { %1430 = vst [vmem:[#allocation2 + $0xa0] sm:$0xff] %v1354_v18   ;;  %v630_v21 = vpop.f32.mrf.mxu3  ;;  %v731_v27 = vadd.f32 %v1589_v24, %v461_v20 }
  0xe3   :  { %v383_v22 = vpop.f32.mrf.mxu0 }
  0xe4   :  { %v700_v25 = vadd.f32 %v1589_v24, %v383_v22  ;;  %v552_v26 = vpop.f32.mrf.mxu1  ;;  %v795_v32 = vmax.f32 %v731_v27, 0.0 }
  0xe6   :  { %v764_v28 = vmax.f32 %v700_v25, 0.0  ;;  %v859_v41 = vadd.f32 %v795_v32, %v630_v21 }
  0xe8   :  { %v828_v30 = vadd.f32 %v764_v28, %v552_v26 }
  0xe9   :  { %v463_v31 = vpop.f32.mrf.mxu2 }
  0xea   :  { %v1279_v33 = vpack.c.bf16 %v828_v30, %v827_v29  ;;  %v732_v34 = vadd.f32 %v1589_v24, %v463_v31  ;;  %v632_v35 = vpop.f32.mrf.mxu3 }
  0xeb   :  { %v386_v38 = vpop.f32.mrf.mxu0 }
  0xec   :  { %1415 = vst [vmem:[#allocation2 + $0x28] sm:$0xff] %v1279_v33   ;;  %v796_v39 = vmax.f32 %v732_v34, 0.0  ;;  %v555_v40 = vpop.f32.mrf.mxu1  ;;  %v701_v44 = vadd.f32 %v1589_v24, %v386_v38 }
  0xee   :  { %v860_v42 = vadd.f32 %v796_v39, %v632_v35  ;;  %1169 = vmatmul.msk.bf16.gmra.mxu0 %vm245_vm1, %v1233_v36  ;;  %1185 = vmatmul.msk.bf16.gmra.mxu2 %vm245_vm1, %v1249_v37  ;;  %v765_v48 = vmax.f32 %v701_v44, 0.0 }
  0xef   :  { %1217 = vmatmul.msk.bf16.gmra.mxu3 %vm245_vm1, %v1249_v37  ;;  %1201 = vmatmul.msk.bf16.gmra.mxu1 %vm245_vm1, %v1233_v36 }
  0xf0   :  { %v1359_v43 = vpack.c.bf16 %v860_v42, %v859_v41  ;;  %v829_v53 = vadd.f32 %v765_v48, %v555_v40 }
  0xf1   :  { %v466_v45 = vpop.f32.mrf.mxu2 }
  0xf2   :  { %1431 = vst [vmem:[#allocation2 + $0xa8] sm:$0xff] %v1359_v43   ;;  %v635_v46 = vpop.f32.mrf.mxu3  ;;  %v733_v51 = vadd.f32 %v1589_v24, %v466_v45 }
  0xf3   :  { %v388_v47 = vpop.f32.mrf.mxu0 }
  0xf4   :  { %v702_v49 = vadd.f32 %v1589_v24, %v388_v47  ;;  %v557_v50 = vpop.f32.mrf.mxu1  ;;  %v797_v56 = vmax.f32 %v733_v51, 0.0 }
  0xf6   :  { %v766_v52 = vmax.f32 %v702_v49, 0.0  ;;  %v861_v1 = vadd.f32 %v797_v56, %v635_v46 }
  0xf8   :  { %v830_v54 = vadd.f32 %v766_v52, %v557_v50 }
  0xf9   :  { %v468_v55 = vpop.f32.mrf.mxu2 }
  0xfa   :  { %v1284_v57 = vpack.c.bf16 %v830_v54, %v829_v53  ;;  %v734_v58 = vadd.f32 %v1589_v24, %v468_v55  ;;  %v637_v59 = vpop.f32.mrf.mxu3 }
  0xfb   :  { %v391_v62 = vpop.f32.mrf.mxu0 }
  0xfc   :  { %1416 = vst [vmem:[#allocation2 + $0x30] sm:$0xff] %v1284_v57   ;;  %v798_v63 = vmax.f32 %v734_v58, 0.0  ;;  %v560_v0 = vpop.f32.mrf.mxu1  ;;  %v703_v4 = vadd.f32 %v1589_v24, %v391_v62 }
  0xfe   :  { %v862_v2 = vadd.f32 %v798_v63, %v637_v59  ;;  %1170 = vmatmul.msk.bf16.gmra.mxu0 %vm245_vm1, %v1234_v60  ;;  %1186 = vmatmul.msk.bf16.gmra.mxu2 %vm245_vm1, %v1250_v61  ;;  %v767_v8 = vmax.f32 %v703_v4, 0.0 }
  0xff   :  { %1218 = vmatmul.msk.bf16.gmra.mxu3 %vm245_vm1, %v1250_v61  ;;  %1202 = vmatmul.msk.bf16.gmra.mxu1 %vm245_vm1, %v1234_v60 }
 0x100   :  { %v1364_v3 = vpack.c.bf16 %v862_v2, %v861_v1  ;;  %v831_v13 = vadd.f32 %v767_v8, %v560_v0 }
 0x101   :  { %v471_v5 = vpop.f32.mrf.mxu2 }
 0x102   :  { %1432 = vst [vmem:[#allocation2 + $0xb0] sm:$0xff] %v1364_v3   ;;  %v640_v6 = vpop.f32.mrf.mxu3  ;;  %v735_v11 = vadd.f32 %v1589_v24, %v471_v5 }
 0x103   :  { %v393_v7 = vpop.f32.mrf.mxu0 }
 0x104   :  { %v704_v9 = vadd.f32 %v1589_v24, %v393_v7  ;;  %v562_v10 = vpop.f32.mrf.mxu1  ;;  %v799_v16 = vmax.f32 %v735_v11, 0.0 }
 0x106   :  { %v768_v12 = vmax.f32 %v704_v9, 0.0  ;;  %v863_v23 = vadd.f32 %v799_v16, %v640_v6 }
 0x108   :  { %v832_v14 = vadd.f32 %v768_v12, %v562_v10 }
 0x109   :  { %v473_v15 = vpop.f32.mrf.mxu2 }
 0x10a   :  { %v1289_v17 = vpack.c.bf16 %v832_v14, %v831_v13  ;;  %v736_v18 = vadd.f32 %v1589_v24, %v473_v15  ;;  %v642_v19 = vpop.f32.mrf.mxu3 }
 0x10b   :  { %v396_v20 = vpop.f32.mrf.mxu0 }
 0x10c   :  { %1417 = vst [vmem:[#allocation2 + $0x38] sm:$0xff] %v1289_v17   ;;  %v800_v21 = vmax.f32 %v736_v18, 0.0  ;;  %v565_v22 = vpop.f32.mrf.mxu1  ;;  %v705_v27 = vadd.f32 %v1589_v24, %v396_v20 }
 0x10e   :  { %v864_v25 = vadd.f32 %v800_v21, %v642_v19  ;;  %v769_v31 = vmax.f32 %v705_v27, 0.0 }
 0x110   :  { %v1369_v26 = vpack.c.bf16 %v864_v25, %v863_v23  ;;  %v833_v36 = vadd.f32 %v769_v31, %v565_v22 }
 0x111   :  { %v476_v28 = vpop.f32.mrf.mxu2 }
 0x112   :  { %1433 = vst [vmem:[#allocation2 + $0xb8] sm:$0xff] %v1369_v26   ;;  %v645_v29 = vpop.f32.mrf.mxu3  ;;  %v737_v34 = vadd.f32 %v1589_v24, %v476_v28 }
 0x113   :  { %v398_v30 = vpop.f32.mrf.mxu0 }
 0x114   :  { %v706_v32 = vadd.f32 %v1589_v24, %v398_v30  ;;  %v567_v33 = vpop.f32.mrf.mxu1  ;;  %v801_v39 = vmax.f32 %v737_v34, 0.0 }
 0x116   :  { %v770_v35 = vmax.f32 %v706_v32, 0.0  ;;  %v865_v46 = vadd.f32 %v801_v39, %v645_v29 }
 0x118   :  { %v834_v37 = vadd.f32 %v770_v35, %v567_v33 }
 0x119   :  { %v478_v38 = vpop.f32.mrf.mxu2 }
 0x11a   :  { %v1294_v40 = vpack.c.bf16 %v834_v37, %v833_v36  ;;  %v738_v41 = vadd.f32 %v1589_v24, %v478_v38  ;;  %v647_v42 = vpop.f32.mrf.mxu3 }
 0x11b   :  { %v401_v43 = vpop.f32.mrf.mxu0 }
 0x11c   :  { %1418 = vst [vmem:[#allocation2 + $0x40] sm:$0xff] %v1294_v40   ;;  %v802_v44 = vmax.f32 %v738_v41, 0.0  ;;  %v570_v45 = vpop.f32.mrf.mxu1  ;;  %v707_v49 = vadd.f32 %v1589_v24, %v401_v43 }
 0x11e   :  { %v866_v47 = vadd.f32 %v802_v44, %v647_v42  ;;  %v771_v53 = vmax.f32 %v707_v49, 0.0 }
 0x120   :  { %v1374_v48 = vpack.c.bf16 %v866_v47, %v865_v46  ;;  %v835_v58 = vadd.f32 %v771_v53, %v570_v45 }
 0x121   :  { %v481_v50 = vpop.f32.mrf.mxu2 }
 0x122   :  { %1434 = vst [vmem:[#allocation2 + $0xc0] sm:$0xff] %v1374_v48   ;;  %v650_v51 = vpop.f32.mrf.mxu3  ;;  %v739_v56 = vadd.f32 %v1589_v24, %v481_v50 }
 0x123   :  { %v403_v52 = vpop.f32.mrf.mxu0 }
 0x124   :  { %v708_v54 = vadd.f32 %v1589_v24, %v403_v52  ;;  %v572_v55 = vpop.f32.mrf.mxu1  ;;  %v803_v61 = vmax.f32 %v739_v56, 0.0 }
 0x126   :  { %v772_v57 = vmax.f32 %v708_v54, 0.0  ;;  %v867_v4 = vadd.f32 %v803_v61, %v650_v51 }
 0x128   :  { %v836_v59 = vadd.f32 %v772_v57, %v572_v55 }
 0x129   :  { %v483_v60 = vpop.f32.mrf.mxu2 }
 0x12a   :  { %v1299_v62 = vpack.c.bf16 %v836_v59, %v835_v58  ;;  %v740_v63 = vadd.f32 %v1589_v24, %v483_v60  ;;  %v652_v0 = vpop.f32.mrf.mxu3 }
 0x12b   :  { %v406_v1 = vpop.f32.mrf.mxu0 }
 0x12c   :  { %1419 = vst [vmem:[#allocation2 + $0x48] sm:$0xff] %v1299_v62   ;;  %v804_v2 = vmax.f32 %v740_v63, 0.0  ;;  %v575_v3 = vpop.f32.mrf.mxu1  ;;  %v709_v7 = vadd.f32 %v1589_v24, %v406_v1 }
 0x12e   :  { %v868_v5 = vadd.f32 %v804_v2, %v652_v0  ;;  %v773_v11 = vmax.f32 %v709_v7, 0.0 }
 0x130   :  { %v1379_v6 = vpack.c.bf16 %v868_v5, %v867_v4  ;;  %v837_v16 = vadd.f32 %v773_v11, %v575_v3 }
 0x131   :  { %v486_v8 = vpop.f32.mrf.mxu2 }
 0x132   :  { %1435 = vst [vmem:[#allocation2 + $0xc8] sm:$0xff] %v1379_v6   ;;  %v655_v9 = vpop.f32.mrf.mxu3  ;;  %v741_v14 = vadd.f32 %v1589_v24, %v486_v8 }
 0x133   :  { %v408_v10 = vpop.f32.mrf.mxu0 }
 0x134   :  { %v710_v12 = vadd.f32 %v1589_v24, %v408_v10  ;;  %v577_v13 = vpop.f32.mrf.mxu1  ;;  %v805_v19 = vmax.f32 %v741_v14, 0.0 }
 0x136   :  { %v774_v15 = vmax.f32 %v710_v12, 0.0  ;;  %v869_v27 = vadd.f32 %v805_v19, %v655_v9 }
 0x138   :  { %v838_v17 = vadd.f32 %v774_v15, %v577_v13 }
 0x139   :  { %v488_v18 = vpop.f32.mrf.mxu2 }
 0x13a   :  { %v1304_v20 = vpack.c.bf16 %v838_v17, %v837_v16  ;;  %v742_v21 = vadd.f32 %v1589_v24, %v488_v18  ;;  %v657_v22 = vpop.f32.mrf.mxu3 }
 0x13b   :  { %v411_v23 = vpop.f32.mrf.mxu0 }
 0x13c   :  { %1420 = vst [vmem:[#allocation2 + $0x50] sm:$0xff] %v1304_v20   ;;  %v806_v25 = vmax.f32 %v742_v21, 0.0  ;;  %v580_v26 = vpop.f32.mrf.mxu1  ;;  %v711_v30 = vadd.f32 %v1589_v24, %v411_v23 }
 0x13e   :  { %v870_v28 = vadd.f32 %v806_v25, %v657_v22  ;;  %v775_v34 = vmax.f32 %v711_v30, 0.0 }
 0x140   :  { %v1384_v29 = vpack.c.bf16 %v870_v28, %v869_v27  ;;  %v839_v39 = vadd.f32 %v775_v34, %v580_v26 }
 0x141   :  { %v491_v31 = vpop.f32.mrf.mxu2 }
 0x142   :  { %1436 = vst [vmem:[#allocation2 + $0xd0] sm:$0xff] %v1384_v29   ;;  %v660_v32 = vpop.f32.mrf.mxu3  ;;  %v743_v37 = vadd.f32 %v1589_v24, %v491_v31 }
 0x143   :  { %v413_v33 = vpop.f32.mrf.mxu0 }
 0x144   :  { %v712_v35 = vadd.f32 %v1589_v24, %v413_v33  ;;  %v582_v36 = vpop.f32.mrf.mxu1  ;;  %v807_v42 = vmax.f32 %v743_v37, 0.0 }
 0x146   :  { %v776_v38 = vmax.f32 %v712_v35, 0.0  ;;  %v871_v49 = vadd.f32 %v807_v42, %v660_v32 }
 0x148   :  { %v840_v40 = vadd.f32 %v776_v38, %v582_v36 }
 0x149   :  { %v493_v41 = vpop.f32.mrf.mxu2 }
 0x14a   :  { %v1309_v43 = vpack.c.bf16 %v840_v40, %v839_v39  ;;  %v744_v44 = vadd.f32 %v1589_v24, %v493_v41  ;;  %v662_v45 = vpop.f32.mrf.mxu3 }
 0x14b   :  { %v416_v46 = vpop.f32.mrf.mxu0 }
 0x14c   :  { %1421 = vst [vmem:[#allocation2 + $0x58] sm:$0xff] %v1309_v43   ;;  %v808_v47 = vmax.f32 %v744_v44, 0.0  ;;  %v585_v48 = vpop.f32.mrf.mxu1  ;;  %v713_v52 = vadd.f32 %v1589_v24, %v416_v46 }
 0x14e   :  { %v872_v50 = vadd.f32 %v808_v47, %v662_v45  ;;  %v777_v56 = vmax.f32 %v713_v52, 0.0 }
 0x150   :  { %v1389_v51 = vpack.c.bf16 %v872_v50, %v871_v49  ;;  %v841_v61 = vadd.f32 %v777_v56, %v585_v48 }
 0x151   :  { %v496_v53 = vpop.f32.mrf.mxu2 }
 0x152   :  { %1437 = vst [vmem:[#allocation2 + $0xd8] sm:$0xff] %v1389_v51   ;;  %v665_v54 = vpop.f32.mrf.mxu3  ;;  %v745_v59 = vadd.f32 %v1589_v24, %v496_v53 }
 0x153   :  { %v418_v55 = vpop.f32.mrf.mxu0 }
 0x154   :  { %v714_v57 = vadd.f32 %v1589_v24, %v418_v55  ;;  %v587_v58 = vpop.f32.mrf.mxu1  ;;  %v809_v0 = vmax.f32 %v745_v59, 0.0 }
 0x156   :  { %v778_v60 = vmax.f32 %v714_v57, 0.0  ;;  %v873_v7 = vadd.f32 %v809_v0, %v665_v54 }
 0x158   :  { %v842_v62 = vadd.f32 %v778_v60, %v587_v58 }
 0x159   :  { %v498_v63 = vpop.f32.mrf.mxu2 }
 0x15a   :  { %v1314_v1 = vpack.c.bf16 %v842_v62, %v841_v61  ;;  %v746_v2 = vadd.f32 %v1589_v24, %v498_v63  ;;  %v667_v3 = vpop.f32.mrf.mxu3 }
 0x15b   :  { %v421_v4 = vpop.f32.mrf.mxu0 }
 0x15c   :  { %1422 = vst [vmem:[#allocation2 + $0x60] sm:$0xff] %v1314_v1   ;;  %v810_v5 = vmax.f32 %v746_v2, 0.0  ;;  %v590_v6 = vpop.f32.mrf.mxu1  ;;  %v715_v10 = vadd.f32 %v1589_v24, %v421_v4 }
 0x15e   :  { %v874_v8 = vadd.f32 %v810_v5, %v667_v3  ;;  %v779_v14 = vmax.f32 %v715_v10, 0.0 }
 0x160   :  { %v1394_v9 = vpack.c.bf16 %v874_v8, %v873_v7  ;;  %v843_v19 = vadd.f32 %v779_v14, %v590_v6 }
 0x161   :  { %v501_v11 = vpop.f32.mrf.mxu2 }
 0x162   :  { %1438 = vst [vmem:[#allocation2 + $0xe0] sm:$0xff] %v1394_v9   ;;  %v670_v12 = vpop.f32.mrf.mxu3  ;;  %v747_v17 = vadd.f32 %v1589_v24, %v501_v11 }
 0x163   :  { %v423_v13 = vpop.f32.mrf.mxu0 }
 0x164   :  { %v716_v15 = vadd.f32 %v1589_v24, %v423_v13  ;;  %v592_v16 = vpop.f32.mrf.mxu1  ;;  %v811_v22 = vmax.f32 %v747_v17, 0.0 }
 0x166   :  { %v780_v18 = vmax.f32 %v716_v15, 0.0  ;;  %v875_v30 = vadd.f32 %v811_v22, %v670_v12 }
 0x168   :  { %v844_v20 = vadd.f32 %v780_v18, %v592_v16 }
 0x169   :  { %v503_v21 = vpop.f32.mrf.mxu2 }
 0x16a   :  { %v1319_v23 = vpack.c.bf16 %v844_v20, %v843_v19  ;;  %v748_v25 = vadd.f32 %v1589_v24, %v503_v21  ;;  %v672_v26 = vpop.f32.mrf.mxu3 }
 0x16b   :  { %v426_v27 = vpop.f32.mrf.mxu0 }
 0x16c   :  { %1423 = vst [vmem:[#allocation2 + $0x68] sm:$0xff] %v1319_v23   ;;  %v812_v28 = vmax.f32 %v748_v25, 0.0  ;;  %v595_v29 = vpop.f32.mrf.mxu1  ;;  %v717_v33 = vadd.f32 %v1589_v24, %v426_v27 }
 0x16e   :  { %v876_v31 = vadd.f32 %v812_v28, %v672_v26  ;;  %v781_v37 = vmax.f32 %v717_v33, 0.0 }
 0x170   :  { %v1399_v32 = vpack.c.bf16 %v876_v31, %v875_v30  ;;  %v845_v42 = vadd.f32 %v781_v37, %v595_v29 }
 0x171   :  { %v506_v34 = vpop.f32.mrf.mxu2 }
 0x172   :  { %1439 = vst [vmem:[#allocation2 + $0xe8] sm:$0xff] %v1399_v32   ;;  %v675_v35 = vpop.f32.mrf.mxu3  ;;  %v749_v40 = vadd.f32 %v1589_v24, %v506_v34 }
 0x173   :  { %v428_v36 = vpop.f32.mrf.mxu0 }
 0x174   :  { %v718_v38 = vadd.f32 %v1589_v24, %v428_v36  ;;  %v597_v39 = vpop.f32.mrf.mxu1  ;;  %v813_v45 = vmax.f32 %v749_v40, 0.0 }
 0x176   :  { %v782_v41 = vmax.f32 %v718_v38, 0.0  ;;  %v877_v52 = vadd.f32 %v813_v45, %v675_v35 }
 0x178   :  { %v846_v43 = vadd.f32 %v782_v41, %v597_v39 }
 0x179   :  { %v508_v44 = vpop.f32.mrf.mxu2 }
 0x17a   :  { %v1324_v46 = vpack.c.bf16 %v846_v43, %v845_v42  ;;  %v750_v47 = vadd.f32 %v1589_v24, %v508_v44  ;;  %v677_v48 = vpop.f32.mrf.mxu3 }
 0x17b   :  { %v431_v49 = vpop.f32.mrf.mxu0 }
 0x17c   :  { %1424 = vst [vmem:[#allocation2 + $0x70] sm:$0xff] %v1324_v46   ;;  %v814_v50 = vmax.f32 %v750_v47, 0.0  ;;  %v600_v51 = vpop.f32.mrf.mxu1  ;;  %v719_v55 = vadd.f32 %v1589_v24, %v431_v49 }
 0x17e   :  { %v878_v53 = vadd.f32 %v814_v50, %v677_v48  ;;  %v783_v59 = vmax.f32 %v719_v55, 0.0 }
 0x180   :  { %v1404_v54 = vpack.c.bf16 %v878_v53, %v877_v52  ;;  %v847_v0 = vadd.f32 %v783_v59, %v600_v51 }
 0x181   :  { %v511_v56 = vpop.f32.mrf.mxu2 }
 0x182   :  { %1440 = vst [vmem:[#allocation2 + $0xf0] sm:$0xff] %v1404_v54   ;;  %v680_v57 = vpop.f32.mrf.mxu3  ;;  %v751_v61 = vadd.f32 %v1589_v24, %v511_v56 }
 0x183   :  { %v433_v58 = vpop.f32.mrf.mxu0 }
 0x184   :  { %v720_v60 = vadd.f32 %v1589_v24, %v433_v58  ;;  %v602_v63 = vpop.f32.mrf.mxu1  ;;  %v815_v3 = vmax.f32 %v751_v61, 0.0 }
 0x186   :  { %v784_v62 = vmax.f32 %v720_v60, 0.0  ;;  %v879_v8 = vadd.f32 %v815_v3, %v680_v57 }
 0x188   :  { %v848_v1 = vadd.f32 %v784_v62, %v602_v63 }
 0x189   :  { %v513_v2 = vpop.f32.mrf.mxu2 }
 0x18a   :  { %v1329_v4 = vpack.c.bf16 %v848_v1, %v847_v0  ;;  %v752_v5 = vadd.f32 %v1589_v24, %v513_v2  ;;  %v682_v7 = vpop.f32.mrf.mxu3 }
 0x18c   :  { %1425 = vst [vmem:[#allocation2 + $0x78] sm:$0xff] %v1329_v4   ;;  %v816_v6 = vmax.f32 %v752_v5, 0.0 }
 0x18e   :  { %v880_v9 = vadd.f32 %v816_v6, %v682_v7 }
 0x190   :  { %v1409_v10 = vpack.c.bf16 %v880_v9, %v879_v8 }
 0x192   :  { %1441 = vst [vmem:[#allocation2 + $0xf8] sm:$0xff] %v1409_v10  }
 0x193   :  { %1021 = dma.vmem_to_hbm [thread:$0]  %s1014_s22, 4096, %s1016_s24, [#allocation3], %s1475_s25, %s1475_s25, %s1476_s26  }
 0x194   :  { %1472 = dma.done.wait [#allocation3], 4096  }
 0x195   :  { %1473 = vsyncadd [#allocation3], 4294963200 }
 0x196   :  { %1026 = vsyncpa [#allocation3], 1 }

</bundles_post_ra>
